<compile_context>
chip_gen: v5e
topology: v5e:2x2
jax: 0.10.0
libtpu: 0.0.40
codegen_flags: <defaults>
</compile_context>

<pallas_src>
import math

import jax
import jax.numpy as jnp
from jax.experimental import pallas as pl
from jax.experimental.pallas import tpu as pltpu

BN_EPS = 1e-5
LOG_MEAN_MIN = math.log(1e-5)
LOG_MEAN_MAX = math.log(1e6)
MATMUL_DTYPE = jnp.bfloat16  # MXU-native input dtype; accumulation is f32


# --------------------------------------------------------------------------
# helpers
# --------------------------------------------------------------------------
def _round_up(v, m):
    return (v + m - 1) // m * m


def _cdiv(a, b):
    return -(-a // b)


def _pad2(a, rows, cols, dtype=None):
    a = jnp.pad(a, ((0, rows - a.shape[0]), (0, cols - a.shape[1])))
    return a.astype(dtype) if dtype is not None else a


def _vmem_capacity_bytes():
    """Per-core VMEM capacity (v5e/v6e: 128 MiB, v7x: 64 MiB), with fallback."""
    try:
        cap = int(pltpu.get_tpu_info().vmem_capacity_bytes)
    except Exception:
        cap = 64 * 1024 * 1024  # conservative default (v7x per-TC VMEM)
    return max(32 * 1024 * 1024, min(cap, 128 * 1024 * 1024))


def _pick_cap_tile(b_pad, h_pad, budget):
    """Largest head tile width (multiple of 128, <=1024) that fits the budget."""
    for tile in (1024, 768, 512, 384, 256, 128):
        need = (2 * b_pad * h_pad * 2      # resident d (bf16, double-buffered)
                + 2 * h_pad * tile * 2     # head-weight tile (bf16) x2 buffers
                + 2 * 8 * tile * 4         # bias tile (sublane-padded) x2
                + 2 * b_pad * tile * 4     # f32 output tile x2 buffers
                + 4 * b_pad * tile)        # headroom for f32 temporaries
        if need <= budget:
            return tile
    return 128


# --------------------------------------------------------------------------
# in-kernel activation helpers
# --------------------------------------------------------------------------
def _sigmoid(t):
    # sigmoid via EUP exp + approx reciprocal (divide stays off the VPU path).
    e = jnp.exp(jnp.minimum(-t, 80.0))
    return jnp.minimum(pl.reciprocal(1.0 + e, approx=True), 1.0)


def _disp_act(t):
    # DispAct: clamp(softplus(t), 1e-4, 1e4) with a numerically stable softplus.
    sp = jnp.maximum(t, 0.0) + jnp.log1p(jnp.exp(-jnp.abs(t)))
    return jnp.clip(sp, 1e-4, 1e4)


def _mean_act(t):
    # MeanAct: clamp(exp(t), 1e-5, 1e6) == exp(clamp(t, log 1e-5, log 1e6)).
    return jnp.exp(jnp.clip(t, LOG_MEAN_MIN, LOG_MEAN_MAX))


# --------------------------------------------------------------------------
# kernels
# --------------------------------------------------------------------------
def _make_trunk_kernel(b_real, b_pad):
    """Encoder_1 -> encoder_2 -> decoder_1, output d in bf16."""
    need_mask = b_real != b_pad
    inv_n = 1.0 / float(b_real)

    def bn_relu(h, gamma, beta, row_mask):
        # Training-mode BatchNorm1d (biased variance) + ReLU; padded batch rows
        # are masked out of the statistics.
        hs = h * row_mask if need_mask else h
        mu = jnp.sum(hs, axis=0, keepdims=True) * inv_n
        hc = h - mu                                   # reused for var and y
        hcs = hc * row_mask if need_mask else hc
        var = jnp.sum(hcs * hcs, axis=0, keepdims=True) * inv_n
        scale = gamma * jax.lax.rsqrt(var + BN_EPS)   # folded scale (EUP rsqrt)
        return jnp.maximum(hc * scale + beta, 0.0)

    def kernel(x_ref, w1_ref, w2_ref, w3_ref, gbh_ref, gbz_ref, d_ref):
        if need_mask:
            rows = jax.lax.broadcasted_iota(jnp.int32, (b_pad, 1), 0)
            row_mask = (rows < b_real).astype(jnp.float32)
        else:
            row_mask = None

        gbh = gbh_ref[...]   # rows: [gamma1, beta1, gamma3, beta3]
        gbz = gbz_ref[...]   # rows: [gamma2, beta2]

        # NOTE: Linear biases before training-mode BN cancel exactly, so they
        # are omitted entirely (fewer operands / VPU adds, identical output).
        h1 = jnp.dot(x_ref[...], w1_ref[...],
                     preferred_element_type=jnp.float32)
        h1 = bn_relu(h1, gbh[0:1, :], gbh[1:2, :], row_mask)

        z = jnp.dot(h1.astype(MATMUL_DTYPE), w2_ref[...],
                    preferred_element_type=jnp.float32)
        z = bn_relu(z, gbz[0:1, :], gbz[1:2, :], row_mask)

        d = jnp.dot(z.astype(MATMUL_DTYPE), w3_ref[...],
                    preferred_element_type=jnp.float32)
        d = bn_relu(d, gbh[2:3, :], gbh[3:4, :], row_mask)

        d_ref[...] = d.astype(MATMUL_DTYPE)

    return kernel


def _make_heads_fused_kernel(nh):
    """Single-step heads kernel: one matmul over [pi|disp|mean], static slices."""
    def kernel(d_ref, wh_ref, bh_ref, out_ref):
        t = jnp.dot(d_ref[...], wh_ref[...],
                    preferred_element_type=jnp.float32) + bh_ref[...]
        out_ref[:, 0:nh] = _sigmoid(t[:, 0:nh])
        out_ref[:, nh:2 * nh] = _disp_act(t[:, nh:2 * nh])
        out_ref[:, 2 * nh:3 * nh] = _mean_act(t[:, 2 * nh:3 * nh])
    return kernel


def _make_heads_tiled_kernel(tiles_per_head):
    """Tiled heads kernel: grid = (3 * tiles_per_head,), fully parallel."""
    def kernel(d_ref, wh_ref, bh_ref, out_ref):
        head = pl.program_id(0) // tiles_per_head   # 0 = pi, 1 = disp, 2 = mean
        t = jnp.dot(d_ref[...], wh_ref[...],
                    preferred_element_type=jnp.float32) + bh_ref[...]

        @pl.when(head == 0)
        def _pi():
            out_ref[...] = _sigmoid(t)

        @pl.when(head == 1)
        def _disp():
            out_ref[...] = _disp_act(t)

        @pl.when(head == 2)
        def _mean():
            out_ref[...] = _mean_act(t)

    return kernel


# --------------------------------------------------------------------------
# wrapper
# --------------------------------------------------------------------------
def zinb_ae_forward(x, params, tile_n_cap=1024):
    """Full forward pass; returns (pi, disp, mean). `tile_n_cap` is static."""
    B, in_size = x.shape
    hidden = params["w1"].shape[1]
    z_size = params["w2"].shape[1]

    Bp = _round_up(B, 16)            # bf16 packs 2 rows per sublane
    INp = _round_up(in_size, 128)
    Hp = _round_up(hidden, 128)
    Zp = _round_up(z_size, 128)
    Nh = INp                          # per-head (lane-aligned) column width

    # ---- VMEM-aware tiling ------------------------------------------------
    vmem_cap = _vmem_capacity_bytes()
    vmem_limit = max(int(vmem_cap * 0.9), 32 * 1024 * 1024)
    tile_budget = int(vmem_cap * 0.6)

    cap_tile = min(_pick_cap_tile(Bp, Hp, tile_budget),
                   max(_round_up(int(tile_n_cap), 128), 128))
    k = _cdiv(Nh, cap_tile)                       # tiles per head (if tiled)
    tile_n = _round_up(_cdiv(Nh, k), 128)         # balanced tile width

    fused_need = (Bp * Hp * 2 + Hp * 3 * Nh * 2 + 8 * 3 * Nh * 4
                  + 3 * Bp * 3 * Nh * 4)
    use_fused = (k == 1) and (fused_need <= tile_budget)
    Nh_pad = Nh if use_fused else k * tile_n

    # ---- operand preparation (pad to vreg/MXU shapes, bf16 matmul inputs) --
    xp = _pad2(x, Bp, INp, MATMUL_DTYPE)
    w1 = _pad2(params["w1"], INp, Hp, MATMUL_DTYPE)
    w2 = _pad2(params["w2"], Hp, Zp, MATMUL_DTYPE)
    w3 = _pad2(params["w3"], Zp, Hp, MATMUL_DTYPE)
    gbh = jnp.concatenate(
        [_pad2(params["g1"], 1, Hp), _pad2(params["be1"], 1, Hp),
         _pad2(params["g3"], 1, Hp), _pad2(params["be3"], 1, Hp)], axis=0)
    gbz = jnp.concatenate(
        [_pad2(params["g2"], 1, Zp), _pad2(params["be2"], 1, Zp)], axis=0)

    # Fused head params: [pi | disp | mean], each padded to Nh_pad columns.
    w_heads = jnp.concatenate(
        [_pad2(params["wpi"], Hp, Nh_pad, MATMUL_DTYPE),
         _pad2(params["wd"], Hp, Nh_pad, MATMUL_DTYPE),
         _pad2(params["wm"], Hp, Nh_pad, MATMUL_DTYPE)], axis=1)
    b_heads = jnp.concatenate(
        [_pad2(params["bpi"], 1, Nh_pad),
         _pad2(params["bd"], 1, Nh_pad),
         _pad2(params["bm"], 1, Nh_pad)], axis=1)

    # ---- call 1: trunk (grid-free, single step) -> d in HBM ---------------
    d = pl.pallas_call(
        _make_trunk_kernel(B, Bp),
        out_shape=jax.ShapeDtypeStruct((Bp, Hp), MATMUL_DTYPE),
        compiler_params=pltpu.CompilerParams(vmem_limit_bytes=vmem_limit),
    )(xp, w1, w2, w3, gbh, gbz)

    # ---- call 2: fused ZINB heads ------------------------------------------
    if use_fused:
        out = pl.pallas_call(
            _make_heads_fused_kernel(Nh_pad),
            out_shape=jax.ShapeDtypeStruct((Bp, 3 * Nh_pad), jnp.float32),
            compiler_params=pltpu.CompilerParams(vmem_limit_bytes=vmem_limit),
        )(d, w_heads, b_heads)
    else:
        # TODO(synk): optionally add a batch grid axis for very large Bp
        # instead of shrinking tile_n; not needed at these sizes.
        out = pl.pallas_call(
            _make_heads_tiled_kernel(k),
            out_shape=jax.ShapeDtypeStruct((Bp, 3 * Nh_pad), jnp.float32),
            grid_spec=pltpu.PrefetchScalarGridSpec(
                num_scalar_prefetch=0,
                grid=(3 * k,),
                in_specs=[
                    pl.BlockSpec((Bp, Hp), lambda j: (0, 0)),      # d (resident)
                    pl.BlockSpec((Hp, tile_n), lambda j: (0, j)),  # weight tile
                    pl.BlockSpec((1, tile_n), lambda j: (0, j)),   # bias tile
                ],
                out_specs=pl.BlockSpec((Bp, tile_n), lambda j: (0, j)),
            ),
            compiler_params=pltpu.CompilerParams(
                dimension_semantics=("parallel",),   # megacore-shardable
                vmem_limit_bytes=vmem_limit,
            ),
        )(d, w_heads, b_heads)

    pi = out[:B, 0:in_size]
    disp = out[:B, Nh_pad:Nh_pad + in_size]
    mean = out[:B, 2 * Nh_pad:2 * Nh_pad + in_size]
    return pi, disp, mean


# --------------------------------------------------------------------------
# params / reference
# --------------------------------------------------------------------------
def init_params(key, in_size, hidden_size, z_size):
    """Deterministic init mimicking PyTorch defaults (uniform +-1/sqrt(fan_in))."""
    keys = jax.random.split(key, 12)

    def lin(kw, kb, fan_in, fan_out):
        bound = 1.0 / jnp.sqrt(fan_in)
        w = jax.random.uniform(kw, (fan_in, fan_out), jnp.float32, -bound, bound)
        b = jax.random.uniform(kb, (1, fan_out), jnp.float32, -bound, bound)
        return w, b

    w1, b1 = lin(keys[0], keys[1], in_size, hidden_size)
    w2, b2 = lin(keys[2], keys[3], hidden_size, z_size)
    w3, b3 = lin(keys[4], keys[5], z_size, hidden_size)
    wpi, bpi = lin(keys[6], keys[7], hidden_size, in_size)
    wd, bd = lin(keys[8], keys[9], hidden_size, in_size)
    wm, bm = lin(keys[10], keys[11], hidden_size, in_size)

    return dict(
        w1=w1, b1=b1,   # b1/b2/b3 kept for interface parity; BN absorbs them
        g1=jnp.ones((1, hidden_size), jnp.float32),
        be1=jnp.zeros((1, hidden_size), jnp.float32),
        w2=w2, b2=b2,
        g2=jnp.ones((1, z_size), jnp.float32),
        be2=jnp.zeros((1, z_size), jnp.float32),
        w3=w3, b3=b3,
        g3=jnp.ones((1, hidden_size), jnp.float32),
        be3=jnp.zeros((1, hidden_size), jnp.float32),
        wpi=wpi, bpi=bpi, wd=wd, bd=bd, wm=wm, bm=bm,
    )


def _reference_forward(x, params):
    """Pure-JAX f32 reference mirroring the PyTorch module (training-mode BN)."""
    def bn_relu(h, g, b):
        mu = jnp.mean(h, axis=0, keepdims=True)
        var = jnp.mean((h - mu) ** 2, axis=0, keepdims=True)
        return jnp.maximum((h - mu) / jnp.sqrt(var + BN_EPS) * g + b, 0.0)

    h1 = bn_relu(x @ params["w1"] + params["b1"], params["g1"], params["be1"])
    z = bn_relu(h1 @ params["w2"] + params["b2"], params["g2"], params["be2"])
    d = bn_relu(z @ params["w3"] + params["b3"], params["g3"], params["be3"])
    pi = jax.nn.sigmoid(d @ params["wpi"] + params["bpi"])
    disp = jnp.clip(jax.nn.softplus(d @ params["wd"] + params["bd"]), 1e-4, 1e4)
    mean = jnp.clip(jnp.exp(d @ params["wm"] + params["bm"]), 1e-5, 1e6)
    return pi, disp, mean


# --------------------------------------------------------------------------
# self-test
# --------------------------------------------------------------------------
if __name__ == "__main__":
    def run_case(case_key, B, in_size, hidden, z_size, tile_n_cap):
        kx, kp = jax.random.split(case_key)
        x = jax.random.normal(kx, (B, in_size), jnp.float32)
        params = init_params(kp, in_size, hidden, z_size)

        fwd = jax.jit(zinb_ae_forward, static_argnames=("tile_n_cap",))
        pi, disp, mean = jax.block_until_ready(
            fwd(x, params, tile_n_cap=tile_n_cap))

        assert pi.shape == (B, in_size)
        assert disp.shape == (B, in_size)
        assert mean.shape == (B, in_size)
        for a in (pi, disp, mean):
            assert bool(jnp.all(jnp.isfinite(a)))
        assert bool(jnp.all((pi >= 0.0) & (pi <= 1.0)))
        assert bool(jnp.all((disp >= 1e-4) & (disp <= 1e4)))
        assert bool(jnp.all((mean > 0.0) & (mean <= 1.0001e6)))

        # loose tolerance vs the f32 reference (kernel uses bf16 MXU inputs)
        pi_r, disp_r, mean_r = _reference_forward(x, params)
        assert float(jnp.max(jnp.abs(pi - pi_r))) < 0.1
        assert float(jnp.max(jnp.abs(disp - disp_r))) < 0.2
        assert float(jnp.max(jnp.abs(mean - mean_r) / (1.0 + mean_r))) < 0.2

    key = jax.random.PRNGKey(0)
    k1, k2 = jax.random.split(key)

    # Small case: exercises the fused single-step heads path + batch masking.
    run_case(k1, B=8, in_size=16, hidden=32, z_size=8, tile_n_cap=1024)
    # Larger case with a forced small tile cap: exercises the tiled,
    # megacore-parallel heads path (3 tiles per head, grid = (9,)).
    run_case(k2, B=20, in_size=300, hidden=64, z_size=16, tile_n_cap=128)

    print("KERNEL_OK")
</pallas_src>

<mosaic_0001>
module attributes {stable_mosaic.version = 11 : i64} {
  func.func @kernel(%arg0: memref<16x128xbf16, #tpu.memory_space<vmem>>, %arg1: memref<128x128xbf16, #tpu.memory_space<vmem>>, %arg2: memref<128x128xbf16, #tpu.memory_space<vmem>>, %arg3: memref<128x128xbf16, #tpu.memory_space<vmem>>, %arg4: memref<4x128xf32, #tpu.memory_space<vmem>>, %arg5: memref<2x128xf32, #tpu.memory_space<vmem>>, %arg6: memref<16x128xbf16, #tpu.memory_space<vmem>>) attributes {dimension_semantics = [], scalar_prefetch = 0 : i64, scratch_operands = 0 : i64, tpu.core_type = #tpu.core_type<tc>} {
    %0 = tpu.iota {dimensions = array<i32: 0>} : vector<16x1xi32>
    %c8_i32 = arith.constant 8 : i32
    %1 = vector.broadcast %c8_i32 : i32 to vector<16x1xi32>
    %2 = arith.cmpi slt, %0, %1 : vector<16x1xi32>
    %3 = arith.extui %2 : vector<16x1xi1> to vector<16x1xi32>
    %4 = arith.sitofp %3 : vector<16x1xi32> to vector<16x1xf32>
    %c0 = arith.constant 0 : index
    %c0_0 = arith.constant 0 : index
    %5 = vector.load %arg4[%c0, %c0_0] : memref<4x128xf32, #tpu.memory_space<vmem>>, vector<4x128xf32>
    %c0_1 = arith.constant 0 : index
    %c0_2 = arith.constant 0 : index
    %6 = vector.load %arg5[%c0_1, %c0_2] : memref<2x128xf32, #tpu.memory_space<vmem>>, vector<2x128xf32>
    %c0_3 = arith.constant 0 : index
    %c0_4 = arith.constant 0 : index
    %7 = vector.load %arg0[%c0_3, %c0_4] : memref<16x128xbf16, #tpu.memory_space<vmem>>, vector<16x128xbf16>
    %c0_5 = arith.constant 0 : index
    %c0_6 = arith.constant 0 : index
    %8 = vector.load %arg1[%c0_5, %c0_6] : memref<128x128xbf16, #tpu.memory_space<vmem>>, vector<128x128xbf16>
    %cst = arith.constant dense<0.000000e+00> : vector<16x128xf32>
    %9 = tpu.matmul %7, %8, %cst {dimension_numbers = #tpu.dot_dimension_numbers<[1], [0], [0], [1], [0, 0, 1, 1], [], []>} : vector<16x128xbf16>, vector<128x128xbf16>, vector<16x128xf32> -> vector<16x128xf32>
    %10 = vector.extract_strided_slice %5 {offsets = [0, 0], sizes = [1, 128], strides = [1, 1]} : vector<4x128xf32> to vector<1x128xf32>
    %11 = vector.extract_strided_slice %5 {offsets = [1, 0], sizes = [1, 128], strides = [1, 1]} : vector<4x128xf32> to vector<1x128xf32>
    %12 = vector.broadcast %4 : vector<16x1xf32> to vector<16x128xf32>
    %13 = arith.mulf %9, %12 : vector<16x128xf32>
    %cst_7 = arith.constant dense<0.000000e+00> : vector<128xf32>
    %14 = vector.multi_reduction <add>, %13, %cst_7 [0] : vector<16x128xf32> to vector<128xf32>
    %15 = vector.shape_cast %14 : vector<128xf32> to vector<1x128xf32>
    %cst_8 = arith.constant 1.250000e-01 : f32
    %16 = vector.broadcast %cst_8 : f32 to vector<1x128xf32>
    %17 = arith.mulf %15, %16 : vector<1x128xf32>
    %18 = vector.broadcast %17 : vector<1x128xf32> to vector<16x128xf32>
    %19 = arith.subf %9, %18 : vector<16x128xf32>
    %20 = vector.broadcast %4 : vector<16x1xf32> to vector<16x128xf32>
    %21 = arith.mulf %19, %20 : vector<16x128xf32>
    %22 = arith.mulf %21, %21 : vector<16x128xf32>
    %cst_9 = arith.constant dense<0.000000e+00> : vector<128xf32>
    %23 = vector.multi_reduction <add>, %22, %cst_9 [0] : vector<16x128xf32> to vector<128xf32>
    %24 = vector.shape_cast %23 : vector<128xf32> to vector<1x128xf32>
    %cst_10 = arith.constant 1.250000e-01 : f32
    %25 = vector.broadcast %cst_10 : f32 to vector<1x128xf32>
    %26 = arith.mulf %24, %25 : vector<1x128xf32>
    %cst_11 = arith.constant 9.99999974E-6 : f32
    %27 = vector.broadcast %cst_11 : f32 to vector<1x128xf32>
    %28 = arith.addf %26, %27 : vector<1x128xf32>
    %29 = math.rsqrt %28 : vector<1x128xf32>
    %30 = arith.mulf %10, %29 : vector<1x128xf32>
    %31 = vector.broadcast %30 : vector<1x128xf32> to vector<16x128xf32>
    %32 = arith.mulf %19, %31 : vector<16x128xf32>
    %33 = vector.broadcast %11 : vector<1x128xf32> to vector<16x128xf32>
    %34 = arith.addf %32, %33 : vector<16x128xf32>
    %cst_12 = arith.constant 0.000000e+00 : f32
    %35 = vector.broadcast %cst_12 : f32 to vector<16x128xf32>
    %36 = arith.maximumf %34, %35 : vector<16x128xf32>
    %37 = arith.truncf %36 : vector<16x128xf32> to vector<16x128xbf16>
    %c0_13 = arith.constant 0 : index
    %c0_14 = arith.constant 0 : index
    %38 = vector.load %arg2[%c0_13, %c0_14] : memref<128x128xbf16, #tpu.memory_space<vmem>>, vector<128x128xbf16>
    %cst_15 = arith.constant dense<0.000000e+00> : vector<16x128xf32>
    %39 = tpu.matmul %37, %38, %cst_15 {dimension_numbers = #tpu.dot_dimension_numbers<[1], [0], [0], [1], [0, 0, 1, 1], [], []>} : vector<16x128xbf16>, vector<128x128xbf16>, vector<16x128xf32> -> vector<16x128xf32>
    %40 = vector.extract_strided_slice %6 {offsets = [0, 0], sizes = [1, 128], strides = [1, 1]} : vector<2x128xf32> to vector<1x128xf32>
    %41 = vector.extract_strided_slice %6 {offsets = [1, 0], sizes = [1, 128], strides = [1, 1]} : vector<2x128xf32> to vector<1x128xf32>
    %42 = vector.broadcast %4 : vector<16x1xf32> to vector<16x128xf32>
    %43 = arith.mulf %39, %42 : vector<16x128xf32>
    %cst_16 = arith.constant dense<0.000000e+00> : vector<128xf32>
    %44 = vector.multi_reduction <add>, %43, %cst_16 [0] : vector<16x128xf32> to vector<128xf32>
    %45 = vector.shape_cast %44 : vector<128xf32> to vector<1x128xf32>
    %cst_17 = arith.constant 1.250000e-01 : f32
    %46 = vector.broadcast %cst_17 : f32 to vector<1x128xf32>
    %47 = arith.mulf %45, %46 : vector<1x128xf32>
    %48 = vector.broadcast %47 : vector<1x128xf32> to vector<16x128xf32>
    %49 = arith.subf %39, %48 : vector<16x128xf32>
    %50 = vector.broadcast %4 : vector<16x1xf32> to vector<16x128xf32>
    %51 = arith.mulf %49, %50 : vector<16x128xf32>
    %52 = arith.mulf %51, %51 : vector<16x128xf32>
    %cst_18 = arith.constant dense<0.000000e+00> : vector<128xf32>
    %53 = vector.multi_reduction <add>, %52, %cst_18 [0] : vector<16x128xf32> to vector<128xf32>
    %54 = vector.shape_cast %53 : vector<128xf32> to vector<1x128xf32>
    %cst_19 = arith.constant 1.250000e-01 : f32
    %55 = vector.broadcast %cst_19 : f32 to vector<1x128xf32>
    %56 = arith.mulf %54, %55 : vector<1x128xf32>
    %cst_20 = arith.constant 9.99999974E-6 : f32
    %57 = vector.broadcast %cst_20 : f32 to vector<1x128xf32>
    %58 = arith.addf %56, %57 : vector<1x128xf32>
    %59 = math.rsqrt %58 : vector<1x128xf32>
    %60 = arith.mulf %40, %59 : vector<1x128xf32>
    %61 = vector.broadcast %60 : vector<1x128xf32> to vector<16x128xf32>
    %62 = arith.mulf %49, %61 : vector<16x128xf32>
    %63 = vector.broadcast %41 : vector<1x128xf32> to vector<16x128xf32>
    %64 = arith.addf %62, %63 : vector<16x128xf32>
    %cst_21 = arith.constant 0.000000e+00 : f32
    %65 = vector.broadcast %cst_21 : f32 to vector<16x128xf32>
    %66 = arith.maximumf %64, %65 : vector<16x128xf32>
    %67 = arith.truncf %66 : vector<16x128xf32> to vector<16x128xbf16>
    %c0_22 = arith.constant 0 : index
    %c0_23 = arith.constant 0 : index
    %68 = vector.load %arg3[%c0_22, %c0_23] : memref<128x128xbf16, #tpu.memory_space<vmem>>, vector<128x128xbf16>
    %cst_24 = arith.constant dense<0.000000e+00> : vector<16x128xf32>
    %69 = tpu.matmul %67, %68, %cst_24 {dimension_numbers = #tpu.dot_dimension_numbers<[1], [0], [0], [1], [0, 0, 1, 1], [], []>} : vector<16x128xbf16>, vector<128x128xbf16>, vector<16x128xf32> -> vector<16x128xf32>
    %70 = vector.extract_strided_slice %5 {offsets = [2, 0], sizes = [1, 128], strides = [1, 1]} : vector<4x128xf32> to vector<1x128xf32>
    %71 = vector.extract_strided_slice %5 {offsets = [3, 0], sizes = [1, 128], strides = [1, 1]} : vector<4x128xf32> to vector<1x128xf32>
    %72 = vector.broadcast %4 : vector<16x1xf32> to vector<16x128xf32>
    %73 = arith.mulf %69, %72 : vector<16x128xf32>
    %cst_25 = arith.constant dense<0.000000e+00> : vector<128xf32>
    %74 = vector.multi_reduction <add>, %73, %cst_25 [0] : vector<16x128xf32> to vector<128xf32>
    %75 = vector.shape_cast %74 : vector<128xf32> to vector<1x128xf32>
    %cst_26 = arith.constant 1.250000e-01 : f32
    %76 = vector.broadcast %cst_26 : f32 to vector<1x128xf32>
    %77 = arith.mulf %75, %76 : vector<1x128xf32>
    %78 = vector.broadcast %77 : vector<1x128xf32> to vector<16x128xf32>
    %79 = arith.subf %69, %78 : vector<16x128xf32>
    %80 = vector.broadcast %4 : vector<16x1xf32> to vector<16x128xf32>
    %81 = arith.mulf %79, %80 : vector<16x128xf32>
    %82 = arith.mulf %81, %81 : vector<16x128xf32>
    %cst_27 = arith.constant dense<0.000000e+00> : vector<128xf32>
    %83 = vector.multi_reduction <add>, %82, %cst_27 [0] : vector<16x128xf32> to vector<128xf32>
    %84 = vector.shape_cast %83 : vector<128xf32> to vector<1x128xf32>
    %cst_28 = arith.constant 1.250000e-01 : f32
    %85 = vector.broadcast %cst_28 : f32 to vector<1x128xf32>
    %86 = arith.mulf %84, %85 : vector<1x128xf32>
    %cst_29 = arith.constant 9.99999974E-6 : f32
    %87 = vector.broadcast %cst_29 : f32 to vector<1x128xf32>
    %88 = arith.addf %86, %87 : vector<1x128xf32>
    %89 = math.rsqrt %88 : vector<1x128xf32>
    %90 = arith.mulf %70, %89 : vector<1x128xf32>
    %91 = vector.broadcast %90 : vector<1x128xf32> to vector<16x128xf32>
    %92 = arith.mulf %79, %91 : vector<16x128xf32>
    %93 = vector.broadcast %71 : vector<1x128xf32> to vector<16x128xf32>
    %94 = arith.addf %92, %93 : vector<16x128xf32>
    %cst_30 = arith.constant 0.000000e+00 : f32
    %95 = vector.broadcast %cst_30 : f32 to vector<16x128xf32>
    %96 = arith.maximumf %94, %95 : vector<16x128xf32>
    %97 = arith.truncf %96 : vector<16x128xf32> to vector<16x128xbf16>
    %c0_31 = arith.constant 0 : index
    %c0_32 = arith.constant 0 : index
    %98 = vector.load %arg6[%c0_31, %c0_32] : memref<16x128xbf16, #tpu.memory_space<vmem>>, vector<16x128xbf16>
    tpu.vector_store %arg6[%c0_31, %c0_32], %97 {strides = array<i32>} : memref<16x128xbf16, #tpu.memory_space<vmem>>, vector<16x128xbf16>,
    return
  }
}

module attributes {stable_mosaic.version = 11 : i64} {
  func.func @kernel(%arg0: memref<16x128xbf16, #tpu.memory_space<vmem>>, %arg1: memref<128x384xbf16, #tpu.memory_space<vmem>>, %arg2: memref<1x384xf32, #tpu.memory_space<vmem>>, %arg3: memref<16x384xf32, #tpu.memory_space<vmem>>) attributes {dimension_semantics = [], scalar_prefetch = 0 : i64, scratch_operands = 0 : i64, tpu.core_type = #tpu.core_type<tc>} {
    %c0 = arith.constant 0 : index
    %c0_0 = arith.constant 0 : index
    %0 = vector.load %arg0[%c0, %c0_0] : memref<16x128xbf16, #tpu.memory_space<vmem>>, vector<16x128xbf16>
    %c0_1 = arith.constant 0 : index
    %c0_2 = arith.constant 0 : index
    %1 = vector.load %arg1[%c0_1, %c0_2] : memref<128x384xbf16, #tpu.memory_space<vmem>>, vector<128x384xbf16>
    %cst = arith.constant dense<0.000000e+00> : vector<16x384xf32>
    %2 = tpu.matmul %0, %1, %cst {dimension_numbers = #tpu.dot_dimension_numbers<[1], [0], [0], [1], [0, 0, 1, 1], [], []>} : vector<16x128xbf16>, vector<128x384xbf16>, vector<16x384xf32> -> vector<16x384xf32>
    %c0_3 = arith.constant 0 : index
    %c0_4 = arith.constant 0 : index
    %3 = vector.load %arg2[%c0_3, %c0_4] : memref<1x384xf32, #tpu.memory_space<vmem>>, vector<1x384xf32>
    %4 = vector.broadcast %3 : vector<1x384xf32> to vector<16x384xf32>
    %5 = arith.addf %2, %4 : vector<16x384xf32>
    %6 = vector.extract_strided_slice %5 {offsets = [0, 0], sizes = [16, 128], strides = [1, 1]} : vector<16x384xf32> to vector<16x128xf32>
    %cst_5 = arith.constant 0.000000e+00 : f32
    %7 = vector.broadcast %cst_5 : f32 to vector<16x128xf32>
    %8 = arith.subf %7, %6 : vector<16x128xf32>
    %cst_6 = arith.constant 8.000000e+01 : f32
    %9 = vector.broadcast %cst_6 : f32 to vector<16x128xf32>
    %10 = arith.minimumf %8, %9 : vector<16x128xf32>
    %11 = math.exp %10 : vector<16x128xf32>
    %cst_7 = arith.constant 1.000000e+00 : f32
    %12 = vector.broadcast %cst_7 : f32 to vector<16x128xf32>
    %13 = arith.addf %12, %11 : vector<16x128xf32>
    %14 = tpu.reciprocal %13 {approx = true} : vector<16x128xf32> -> vector<16x128xf32>
    %cst_8 = arith.constant 1.000000e+00 : f32
    %15 = vector.broadcast %cst_8 : f32 to vector<16x128xf32>
    %16 = arith.minimumf %14, %15 : vector<16x128xf32>
    %c0_9 = arith.constant 0 : index
    %c0_10 = arith.constant 0 : index
    %17 = vector.load %arg3[%c0_9, %c0_10] : memref<16x384xf32, #tpu.memory_space<vmem>>, vector<16x128xf32>
    tpu.vector_store %arg3[%c0_9, %c0_10], %16 {strides = array<i32>} : memref<16x384xf32, #tpu.memory_space<vmem>>, vector<16x128xf32>,
    %18 = vector.extract_strided_slice %5 {offsets = [0, 128], sizes = [16, 128], strides = [1, 1]} : vector<16x384xf32> to vector<16x128xf32>
    %cst_11 = arith.constant 0.000000e+00 : f32
    %19 = vector.broadcast %cst_11 : f32 to vector<16x128xf32>
    %20 = arith.maximumf %18, %19 : vector<16x128xf32>
    %21 = math.absf %18 : vector<16x128xf32>
    %cst_12 = arith.constant 0.000000e+00 : f32
    %22 = vector.broadcast %cst_12 : f32 to vector<16x128xf32>
    %23 = arith.subf %22, %21 : vector<16x128xf32>
    %24 = math.exp %23 : vector<16x128xf32>
    %25 = math.log1p %24 : vector<16x128xf32>
    %26 = arith.addf %20, %25 : vector<16x128xf32>
    %cst_13 = arith.constant 9.99999974E-5 : f32
    %cst_14 = arith.constant 1.000000e+04 : f32
    %27 = vector.broadcast %cst_13 : f32 to vector<16x128xf32>
    %28 = arith.maximumf %27, %26 : vector<16x128xf32>
    %29 = vector.broadcast %cst_14 : f32 to vector<16x128xf32>
    %30 = arith.minimumf %29, %28 : vector<16x128xf32>
    %c0_15 = arith.constant 0 : index
    %c128 = arith.constant 128 : index
    %31 = vector.load %arg3[%c0_15, %c128] : memref<16x384xf32, #tpu.memory_space<vmem>>, vector<16x128xf32>
    tpu.vector_store %arg3[%c0_15, %c128], %30 {strides = array<i32>} : memref<16x384xf32, #tpu.memory_space<vmem>>, vector<16x128xf32>,
    %32 = vector.extract_strided_slice %5 {offsets = [0, 256], sizes = [16, 128], strides = [1, 1]} : vector<16x384xf32> to vector<16x128xf32>
    %cst_16 = arith.constant -11.5129251 : f32
    %cst_17 = arith.constant 13.8155107 : f32
    %33 = vector.broadcast %cst_16 : f32 to vector<16x128xf32>
    %34 = arith.maximumf %33, %32 : vector<16x128xf32>
    %35 = vector.broadcast %cst_17 : f32 to vector<16x128xf32>
    %36 = arith.minimumf %35, %34 : vector<16x128xf32>
    %37 = math.exp %36 : vector<16x128xf32>
    %c0_18 = arith.constant 0 : index
    %c256 = arith.constant 256 : index
    %38 = vector.load %arg3[%c0_18, %c256] : memref<16x384xf32, #tpu.memory_space<vmem>>, vector<16x128xf32>
    tpu.vector_store %arg3[%c0_18, %c256], %37 {strides = array<i32>} : memref<16x384xf32, #tpu.memory_space<vmem>>, vector<16x128xf32>,
    return
  }
}

</mosaic_0001>

<bundles_post_ra>
// kernel: zinb_ae_forward.2
= control target key start
LH: loop header
LB: loop body
LE: loop exit
PB: predicated region body
PF: predicated region fallthrough
CT: control target
= control target key end

     0   :  { %s679_s1 = inlined_call_operand.vmem [shape: bf16[128,128], index: 1, kind: input, shape index: {}]   ;;  %s680_s0 = inlined_call_operand.vmem [shape: bf16[16,128], index: 0, kind: input, shape index: {}]   ;;  %s681_s2 = inlined_call_operand.vmem [shape: bf16[128,128], index: 2, kind: input, shape index: {}]   ;;  %s682_s4 = inlined_call_operand.vmem [shape: f32[4,128], index: 4, kind: input, shape index: {}]   ;;  %s683_s3 = inlined_call_operand.vmem [shape: bf16[128,128], index: 3, kind: input, shape index: {}]   ;;  %s684_s5 = inlined_call_operand.vmem [shape: f32[2,128], index: 5, kind: input, shape index: {}]   ;;  %s685_s6 = inlined_call_operand.vmem [shape: bf16[16,128], index: 6, kind: output, shape index: {}]  }
   0x1   :  { %v526_v0 = vld [vmem:[%s679_s1 + $0x38] sm:$0xff]  ;;  %v525_v1 = vld [vmem:[%s679_s1 + $0x30] sm:$0xff]  ;;  %v524_v2 = vld [vmem:[%s679_s1 + $0x28] sm:$0xff] }
   0x2   :  { %106 = vmatpush.bf16.msra.mxu0 %v526_v0  ;;  %v523_v3 = vld [vmem:[%s679_s1 + $0x20] sm:$0xff]  ;;  %v522_v4 = vld [vmem:[%s679_s1 + $0x18] sm:$0xff]  ;;  %v521_v5 = vld [vmem:[%s679_s1 + $0x10] sm:$0xff] }
   0x3   :  { %v520_v6 = vld [vmem:[%s679_s1 + $0x8] sm:$0xff]  ;;  %v519_v7 = vld [vmem:[%s679_s1] sm:$0xff]  ;;  %v534_v15 = vld [vmem:[%s681_s2 + $0x38] sm:$0xff] }
   0x4   :  { %v518_v8 = vld [vmem:[%s680_s0] sm:$0xff]  ;;  %229 = vmatpush.bf16.msra.mxu1 %v534_v15  ;;  %v533_v18 = vld [vmem:[%s681_s2 + $0x30] sm:$0xff]  ;;  %v532_v21 = vld [vmem:[%s681_s2 + $0x28] sm:$0xff] }
   0x5   :  { %v531_v25 = vld [vmem:[%s681_s2 + $0x20] sm:$0xff]  ;;  %v530_v29 = vld [vmem:[%s681_s2 + $0x18] sm:$0xff]  ;;  %v529_v32 = vld [vmem:[%s681_s2 + $0x10] sm:$0xff] }
   0x6   :  { %107 = vmatpush.bf16.msra.mxu0 %v525_v1  ;;  %v528_v35 = vld [vmem:[%s681_s2 + $0x8] sm:$0xff]  ;;  %v527_v37 = vld [vmem:[%s681_s2] sm:$0xff] }
   0x7   :  { %v643_v47 = vld [vmem:[%s682_s4] sm:$0xf] }
   0x8   :  { %230 = vmatpush.bf16.msra.mxu1 %v533_v18  ;;  %v159_v52 = vperm.slane %v643_v47, 1 }
   0xa   :  { %108 = vmatpush.bf16.msra.mxu0 %v524_v2  ;;  %v542_v2 = vld [vmem:[%s683_s3 + $0x38] sm:$0xff] }
   0xb   :  { %352 = vmatpush.bf16.msra.mxu2 %v542_v2 }
   0xc   :  { %231 = vmatpush.bf16.msra.mxu1 %v532_v21 }
   0xe   :  { %109 = vmatpush.bf16.msra.mxu0 %v523_v3 }
  0x10   :  { %232 = vmatpush.bf16.msra.mxu1 %v531_v25 }
  0x12   :  { %110 = vmatpush.bf16.msra.mxu0 %v522_v4 }
  0x14   :  { %233 = vmatpush.bf16.msra.mxu1 %v530_v29 }
  0x16   :  { %111 = vmatpush.bf16.msra.mxu0 %v521_v5  ;;  %v541_v5 = vld [vmem:[%s683_s3 + $0x30] sm:$0xff] }
  0x17   :  { %353 = vmatpush.bf16.msra.mxu2 %v541_v5 }
  0x18   :  { %234 = vmatpush.bf16.msra.mxu1 %v529_v32 }
  0x1a   :  { %112 = vmatpush.bf16.msra.mxu0 %v520_v6 }
  0x1c   :  { %235 = vmatpush.bf16.msra.mxu1 %v528_v35 }
  0x1e   :  { %113 = vmatpush.bf16.msra.mxu0 %v519_v7 }
  0x20   :  { %236 = vmatpush.bf16.msra.mxu1 %v527_v37 }
  0x21   :  { %114 = vmatmul.bf16.vlgmr.msra.gmra.mxu0 %v518_v8  ;;  %v540_v8 = vld [vmem:[%s683_s3 + $0x28] sm:$0xff] }
  0x22   :  { %354 = vmatpush.bf16.msra.mxu2 %v540_v8 }
  0x9e   :  { %v115_v9 = vpop.f32.mrf.mxu0 }
  0xa6   :  { %v117_v10 = vpop.f32.mrf.mxu0 }
  0xa7   :  { %v121_v11 = vmul.f32 0.0, %v117_v10 }
  0xa9   :  { %v122_v12 = vadd.f32 %v121_v11, %v115_v9 }
  0xab   :  { %v123_v13 = vrot.slane %v122_v12, 4 }
  0xad   :  { %v124_v14 = vadd.f32 %v123_v13, %v122_v12  ;;  %v539_v12 = vld [vmem:[%s683_s3 + $0x20] sm:$0xff] }
  0xae   :  { %355 = vmatpush.bf16.msra.mxu2 %v539_v12 }
  0xaf   :  { %v125_v16 = vrot.slane %v124_v14, 2 }
  0xb1   :  { %v126_v17 = vadd.f32 %v125_v16, %v124_v14  ;;  %v538_v16 = vld [vmem:[%s683_s3 + $0x18] sm:$0xff] }
  0xb2   :  { %356 = vmatpush.bf16.msra.mxu2 %v538_v16 }
  0xb3   :  { %v127_v19 = vrot.slane %v126_v17, 1 }
  0xb5   :  { %v128_v20 = vadd.f32 %v127_v19, %v126_v17  ;;  %v537_v19 = vld [vmem:[%s683_s3 + $0x10] sm:$0xff] }
  0xb6   :  { %357 = vmatpush.bf16.msra.mxu2 %v537_v19 }
  0xb7   :  { %v129_v22 = vmul.f32 0.125, %v128_v20 }
  0xb9   :  { %v130_v23 = vsub.f32 %v115_v9, %v129_v22  ;;  %v131_v24 = vsub.f32 %v117_v10, %v129_v22  ;;  %v536_v22 = vld [vmem:[%s683_s3 + $0x8] sm:$0xff] }
  0xba   :  { %358 = vmatpush.bf16.msra.mxu2 %v536_v22 }
  0xbb   :  { %v133_v26 = vmul.f32 0.0, %v131_v24  ;;  %v134_v27 = vmul.f32 %v130_v23, %v130_v23 }
  0xbd   :  { %v135_v28 = vmul.f32 %v133_v26, %v133_v26 }
  0xbf   :  { %v136_v30 = vadd.f32 %v135_v28, %v134_v27 }
  0xc1   :  { %v137_v31 = vrot.slane %v136_v30, 4 }
  0xc3   :  { %v138_v33 = vadd.f32 %v137_v31, %v136_v30 }
  0xc5   :  { %v139_v34 = vrot.slane %v138_v33, 2 }
  0xc7   :  { %v140_v36 = vadd.f32 %v139_v34, %v138_v33  ;;  %v33_v34 = vld [vmem:[%s684_s5] sm:$0x3] }
  0xc9   :  { %v141_v38 = vrot.slane %v140_v36, 1 }
  0xcb   :  { %v142_v39 = vadd.f32 %v141_v38, %v140_v36 }
  0xcd   :  { %v143_v40 = vmul.f32 0.125, %v142_v39  ;;  %v282_v39 = vperm.slane %v33_v34, 1 }
  0xcf   :  { %v144_v41 = vadd.f32 1e-05, %v143_v40 }
  0xd1   :  { %548 = vrsqrt.f32 %v144_v41  ;;  %vm151_vm1 = vweird.f32 %v144_v41 }
  0xd7   :  { %v549_v42 = vpop.eup %548 }
  0xd8   :  { %v146_v43 = vmul.f32 %v549_v42, %v144_v41  ;;  %vm152_vm0 = vweird.f32 %v549_v42 }
  0xd9   :  { %vm153_vm2 = vmor %vm151_vm1, %vm152_vm0 }
  0xda   :  { %v147_v44 = vmul.f32 %v549_v42, %v146_v43 }
  0xdc   :  { %v148_v45 = vmul.f32 0.5, %v147_v44 }
  0xde   :  { %v149_v46 = vsub.f32 1.5, %v148_v45 }
  0xe0   :  { %v150_v48 = vmul.f32 %v549_v42, %v149_v46 }
  0xe2   :  { %v154_v49 = vsel %vm153_vm2, %v549_v42, %v150_v48 }
  0xe3   :  { %v155_v50 = vmul.f32 %v154_v49, %v643_v47 }
  0xe5   :  { %v156_v51 = vperm.slane %v155_v50, 0 }
  0xe7   :  { %v158_v53 = vmul.f32 %v156_v51, %v131_v24  ;;  %v157_v54 = vmul.f32 %v156_v51, %v130_v23  ;;  %v535_v24 = vld [vmem:[%s683_s3] sm:$0xff] }
  0xe8   :  { %359 = vmatpush.bf16.msra.mxu2 %v535_v24 }
  0xe9   :  { %v160_v55 = vadd.f32 %v159_v52, %v157_v54  ;;  %v161_v56 = vadd.f32 %v159_v52, %v158_v53 }
  0xeb   :  { %v162_v57 = vmax.f32 %v160_v55, 0.0  ;;  %v163_v58 = vmax.f32 %v161_v56, 0.0 }
  0xed   :  { %v164_v59 = vpack.c.bf16 %v163_v58, %v162_v57 }
  0xef   :  { %237 = vmatmul.bf16.vlgmr.msra.gmra.mxu1 %v164_v59 }
 0x16c   :  { %v238_v60 = vpop.f32.mrf.mxu1 }
 0x174   :  { %v240_v61 = vpop.f32.mrf.mxu1 }
 0x175   :  { %v244_v62 = vmul.f32 0.0, %v240_v61 }
 0x177   :  { %v245_v63 = vadd.f32 %v244_v62, %v238_v60 }
 0x179   :  { %v246_v0 = vrot.slane %v245_v63, 4 }
 0x17b   :  { %v247_v1 = vadd.f32 %v246_v0, %v245_v63 }
 0x17d   :  { %v248_v3 = vrot.slane %v247_v1, 2 }
 0x17f   :  { %v249_v4 = vadd.f32 %v248_v3, %v247_v1 }
 0x181   :  { %v250_v6 = vrot.slane %v249_v4, 1 }
 0x183   :  { %v251_v7 = vadd.f32 %v250_v6, %v249_v4 }
 0x185   :  { %v252_v9 = vmul.f32 0.125, %v251_v7 }
 0x187   :  { %v253_v10 = vsub.f32 %v238_v60, %v252_v9  ;;  %v254_v11 = vsub.f32 %v240_v61, %v252_v9 }
 0x189   :  { %v256_v13 = vmul.f32 0.0, %v254_v11  ;;  %v257_v14 = vmul.f32 %v253_v10, %v253_v10 }
 0x18b   :  { %v258_v15 = vmul.f32 %v256_v13, %v256_v13 }
 0x18d   :  { %v259_v17 = vadd.f32 %v258_v15, %v257_v14 }
 0x18f   :  { %v260_v18 = vrot.slane %v259_v17, 4 }
 0x191   :  { %v261_v20 = vadd.f32 %v260_v18, %v259_v17  ;;  %v405_v18 = vperm.slane %v643_v47, 3 }
 0x193   :  { %v262_v21 = vrot.slane %v261_v20, 2 }
 0x195   :  { %v263_v23 = vadd.f32 %v262_v21, %v261_v20 }
 0x197   :  { %v264_v25 = vrot.slane %v263_v23, 1 }
 0x199   :  { %v265_v26 = vadd.f32 %v264_v25, %v263_v23 }
 0x19b   :  { %v266_v27 = vmul.f32 0.125, %v265_v26 }
 0x19d   :  { %v267_v28 = vadd.f32 1e-05, %v266_v27 }
 0x19f   :  { %550 = vrsqrt.f32 %v267_v28  ;;  %vm274_vm4 = vweird.f32 %v267_v28 }
 0x1a5   :  { %v551_v29 = vpop.eup %550 }
 0x1a6   :  { %v269_v30 = vmul.f32 %v551_v29, %v267_v28  ;;  %vm275_vm3 = vweird.f32 %v551_v29 }
 0x1a7   :  { %vm276_vm5 = vmor %vm274_vm4, %vm275_vm3 }
 0x1a8   :  { %v270_v31 = vmul.f32 %v551_v29, %v269_v30 }
 0x1aa   :  { %v271_v32 = vmul.f32 0.5, %v270_v31 }
 0x1ac   :  { %v272_v33 = vsub.f32 1.5, %v271_v32 }
 0x1ae   :  { %v273_v35 = vmul.f32 %v551_v29, %v272_v33 }
 0x1b0   :  { %v277_v36 = vsel %vm276_vm5, %v551_v29, %v273_v35 }
 0x1b1   :  { %v278_v37 = vmul.f32 %v277_v36, %v33_v34 }
 0x1b3   :  { %v279_v38 = vperm.slane %v278_v37, 0 }
 0x1b5   :  { %v281_v40 = vmul.f32 %v279_v38, %v254_v11  ;;  %v280_v41 = vmul.f32 %v279_v38, %v253_v10 }
 0x1b7   :  { %v283_v42 = vadd.f32 %v282_v39, %v280_v41  ;;  %v284_v43 = vadd.f32 %v282_v39, %v281_v40 }
 0x1b9   :  { %v285_v44 = vmax.f32 %v283_v42, 0.0  ;;  %v286_v45 = vmax.f32 %v284_v43, 0.0 }
 0x1bb   :  { %v287_v46 = vpack.c.bf16 %v286_v45, %v285_v44 }
 0x1bd   :  { %360 = vmatmul.bf16.vlgmr.msra.gmra.mxu2 %v287_v46 }
 0x240   :  { %v361_v48 = vpop.f32.mrf.mxu2 }
 0x248   :  { %v363_v49 = vpop.f32.mrf.mxu2 }
 0x249   :  { %v367_v50 = vmul.f32 0.0, %v363_v49 }
 0x24b   :  { %v368_v51 = vadd.f32 %v367_v50, %v361_v48 }
 0x24d   :  { %v369_v52 = vrot.slane %v368_v51, 4 }
 0x24f   :  { %v370_v53 = vadd.f32 %v369_v52, %v368_v51 }
 0x251   :  { %v371_v54 = vrot.slane %v370_v53, 2 }
 0x253   :  { %v372_v55 = vadd.f32 %v371_v54, %v370_v53 }
 0x255   :  { %v373_v56 = vrot.slane %v372_v55, 1 }
 0x257   :  { %v374_v57 = vadd.f32 %v373_v56, %v372_v55 }
 0x259   :  { %v375_v58 = vmul.f32 0.125, %v374_v57 }
 0x25b   :  { %v376_v59 = vsub.f32 %v361_v48, %v375_v58  ;;  %v377_v60 = vsub.f32 %v363_v49, %v375_v58 }
 0x25d   :  { %v379_v61 = vmul.f32 0.0, %v377_v60  ;;  %v380_v62 = vmul.f32 %v376_v59, %v376_v59 }
 0x25f   :  { %v381_v63 = vmul.f32 %v379_v61, %v379_v61 }
 0x261   :  { %v382_v0 = vadd.f32 %v381_v63, %v380_v62 }
 0x263   :  { %v383_v1 = vrot.slane %v382_v0, 4 }
 0x265   :  { %v384_v2 = vadd.f32 %v383_v1, %v382_v0 }
 0x267   :  { %v385_v3 = vrot.slane %v384_v2, 2 }
 0x269   :  { %v386_v4 = vadd.f32 %v385_v3, %v384_v2 }
 0x26b   :  { %v387_v5 = vrot.slane %v386_v4, 1 }
 0x26d   :  { %v388_v6 = vadd.f32 %v387_v5, %v386_v4 }
 0x26f   :  { %v389_v7 = vmul.f32 0.125, %v388_v6 }
 0x271   :  { %v390_v8 = vadd.f32 1e-05, %v389_v7 }
 0x273   :  { %552 = vrsqrt.f32 %v390_v8  ;;  %vm397_vm7 = vweird.f32 %v390_v8 }
 0x279   :  { %v553_v9 = vpop.eup %552 }
 0x27a   :  { %v392_v10 = vmul.f32 %v553_v9, %v390_v8  ;;  %vm398_vm6 = vweird.f32 %v553_v9 }
 0x27b   :  { %vm399_vm8 = vmor %vm397_vm7, %vm398_vm6 }
 0x27c   :  { %v393_v11 = vmul.f32 %v553_v9, %v392_v10 }
 0x27e   :  { %v394_v12 = vmul.f32 0.5, %v393_v11 }
 0x280   :  { %v395_v13 = vsub.f32 1.5, %v394_v12 }
 0x282   :  { %v396_v14 = vmul.f32 %v553_v9, %v395_v13 }
 0x284   :  { %v400_v15 = vsel %vm399_vm8, %v553_v9, %v396_v14 }
 0x285   :  { %v401_v16 = vmul.f32 %v400_v15, %v643_v47 }
 0x287   :  { %v402_v17 = vperm.slane %v401_v16, 2 }
 0x289   :  { %v403_v19 = vmul.f32 %v402_v17, %v376_v59  ;;  %v404_v20 = vmul.f32 %v402_v17, %v377_v60 }
 0x28b   :  { %v406_v21 = vadd.f32 %v405_v18, %v403_v19  ;;  %v407_v22 = vadd.f32 %v405_v18, %v404_v20 }
 0x28d   :  { %v408_v23 = vmax.f32 %v406_v21, 0.0  ;;  %v409_v24 = vmax.f32 %v407_v22, 0.0 }
 0x28f   :  { %v546_v25 = vpack.c.bf16 %v409_v24, %v408_v23 }
 0x291   :  { %547 = vst [vmem:[%s685_s6] sm:$0xff] %v546_v25  }

// kernel: zinb_ae_forward.3
= control target key start
LH: loop header
LB: loop body
LE: loop exit
PB: predicated region body
PF: predicated region fallthrough
CT: control target
= control target key end

     0   :  { %s635_s1 = inlined_call_operand.vmem [shape: bf16[128,384], index: 1, kind: input, shape index: {}]   ;;  %s636_s0 = inlined_call_operand.vmem [shape: bf16[16,128], index: 0, kind: input, shape index: {}]   ;;  %s637_s2 = inlined_call_operand.vmem [shape: f32[1,384], index: 2, kind: input, shape index: {}]   ;;  %s638_s3 = inlined_call_operand.vmem [shape: f32[16,384], index: 3, kind: output, shape index: {}]  }
   0x1   :  { %v388_v0 = vld [vmem:[%s635_s1 + $0xa8] sm:$0xf]  ;;  %v421_v1 = vld [vmem:[%s635_s1 + $0xb0] sm:$0xf0]  ;;  %v420_v2 = vld [vmem:[%s635_s1 + $0xac] sm:$0xf] }
   0x2   :  { %v389_v3 = vor.u32 %v421_v1, %v388_v0  ;;  %v390_v4 = vld [vmem:[%s635_s1 + $0xb4] sm:$0xf0]  ;;  %v376_v5 = vld [vmem:[%s635_s1 + $0x90] sm:$0xf]  ;;  %v418_v6 = vld [vmem:[%s635_s1 + $0x98] sm:$0xf0] }
   0x3   :  { %v393_v7 = vor.u32 %v420_v2, %v390_v4  ;;  %v417_v8 = vld [vmem:[%s635_s1 + $0x94] sm:$0xf]  ;;  %v378_v9 = vld [vmem:[%s635_s1 + $0x9c] sm:$0xf0]  ;;  %v396_v10 = vld [vmem:[%s635_s1 + $0xb0] sm:$0xf]  ;;  %v377_v11 = vor.u32 %v418_v6, %v376_v5 }
   0x4   :  { %190 = vmatpush.bf16.msra.mxu0 %v389_v3  ;;  %v422_v12 = vld [vmem:[%s635_s1 + $0xb8] sm:$0xf0]  ;;  %v381_v13 = vor.u32 %v417_v8, %v378_v9  ;;  %v364_v15 = vld [vmem:[%s635_s1 + $0x78] sm:$0xf]  ;;  %v415_v16 = vld [vmem:[%s635_s1 + $0x80] sm:$0xf0] }
   0x5   :  { %204 = vmatpush.bf16.msra.mxu1 %v393_v7  ;;  %v397_v14 = vor.u32 %v422_v12, %v396_v10  ;;  %v384_v17 = vld [vmem:[%s635_s1 + $0x98] sm:$0xf]  ;;  %v414_v18 = vld [vmem:[%s635_s1 + $0x7c] sm:$0xf]  ;;  %v366_v19 = vld [vmem:[%s635_s1 + $0x84] sm:$0xf0]  ;;  %v365_v22 = vor.u32 %v415_v16, %v364_v15 }
   0x6   :  { %v419_v20 = vld [vmem:[%s635_s1 + $0xa0] sm:$0xf0]  ;;  %v372_v23 = vld [vmem:[%s635_s1 + $0x80] sm:$0xf]  ;;  %v416_v24 = vld [vmem:[%s635_s1 + $0x88] sm:$0xf0]  ;;  %v369_v25 = vor.u32 %v414_v18, %v366_v19 }
   0x7   :  { %218 = vmatpush.bf16.msra.mxu2 %v397_v14  ;;  %v385_v21 = vor.u32 %v419_v20, %v384_v17  ;;  %v352_v26 = vld [vmem:[%s635_s1 + $0x60] sm:$0xf]  ;;  %v412_v27 = vld [vmem:[%s635_s1 + $0x68] sm:$0xf0]  ;;  %v411_v28 = vld [vmem:[%s635_s1 + $0x64] sm:$0xf]  ;;  %v373_v30 = vor.u32 %v416_v24, %v372_v23 }
   0x8   :  { %191 = vmatpush.bf16.msra.mxu0 %v377_v11  ;;  %v354_v29 = vld [vmem:[%s635_s1 + $0x6c] sm:$0xf0]  ;;  %v353_v31 = vor.u32 %v412_v27, %v352_v26  ;;  %v360_v32 = vld [vmem:[%s635_s1 + $0x68] sm:$0xf]  ;;  %v413_v33 = vld [vmem:[%s635_s1 + $0x70] sm:$0xf0] }
   0x9   :  { %205 = vmatpush.bf16.msra.mxu1 %v381_v13  ;;  %v357_v34 = vor.u32 %v411_v28, %v354_v29  ;;  %v340_v35 = vld [vmem:[%s635_s1 + $0x48] sm:$0xf]  ;;  %v409_v36 = vld [vmem:[%s635_s1 + $0x50] sm:$0xf0]  ;;  %v408_v37 = vld [vmem:[%s635_s1 + $0x4c] sm:$0xf]  ;;  %v361_v39 = vor.u32 %v413_v33, %v360_v32 }
   0xa   :  { %v342_v38 = vld [vmem:[%s635_s1 + $0x54] sm:$0xf0]  ;;  %v341_v40 = vor.u32 %v409_v36, %v340_v35  ;;  %v348_v41 = vld [vmem:[%s635_s1 + $0x50] sm:$0xf]  ;;  %v410_v42 = vld [vmem:[%s635_s1 + $0x58] sm:$0xf0] }
   0xb   :  { %219 = vmatpush.bf16.msra.mxu2 %v385_v21  ;;  %v345_v43 = vor.u32 %v408_v37, %v342_v38  ;;  %v328_v44 = vld [vmem:[%s635_s1 + $0x30] sm:$0xf]  ;;  %v406_v45 = vld [vmem:[%s635_s1 + $0x38] sm:$0xf0]  ;;  %v405_v46 = vld [vmem:[%s635_s1 + $0x34] sm:$0xf]  ;;  %v349_v48 = vor.u32 %v410_v42, %v348_v41 }
   0xc   :  { %192 = vmatpush.bf16.msra.mxu0 %v365_v22  ;;  %v330_v47 = vld [vmem:[%s635_s1 + $0x3c] sm:$0xf0]  ;;  %v329_v49 = vor.u32 %v406_v45, %v328_v44  ;;  %v336_v50 = vld [vmem:[%s635_s1 + $0x38] sm:$0xf]  ;;  %v407_v51 = vld [vmem:[%s635_s1 + $0x40] sm:$0xf0] }
   0xd   :  { %206 = vmatpush.bf16.msra.mxu1 %v369_v25  ;;  %v333_v52 = vor.u32 %v405_v46, %v330_v47  ;;  %v316_v53 = vld [vmem:[%s635_s1 + $0x18] sm:$0xf]  ;;  %v403_v54 = vld [vmem:[%s635_s1 + $0x20] sm:$0xf0]  ;;  %v402_v55 = vld [vmem:[%s635_s1 + $0x1c] sm:$0xf]  ;;  %v337_v57 = vor.u32 %v407_v51, %v336_v50 }
   0xe   :  { %v318_v56 = vld [vmem:[%s635_s1 + $0x24] sm:$0xf0]  ;;  %v317_v58 = vor.u32 %v403_v54, %v316_v53  ;;  %v324_v59 = vld [vmem:[%s635_s1 + $0x20] sm:$0xf]  ;;  %v404_v60 = vld [vmem:[%s635_s1 + $0x28] sm:$0xf0] }
   0xf   :  { %220 = vmatpush.bf16.msra.mxu2 %v373_v30  ;;  %v321_v61 = vor.u32 %v402_v55, %v318_v56  ;;  %v304_v62 = vld [vmem:[%s635_s1] sm:$0xf]  ;;  %v400_v63 = vld [vmem:[%s635_s1 + $0x8] sm:$0xf0]  ;;  %v399_v0 = vld [vmem:[%s635_s1 + $0x4] sm:$0xf]  ;;  %v325_v2 = vor.u32 %v404_v60, %v324_v59 }
  0x10   :  { %193 = vmatpush.bf16.msra.mxu0 %v353_v31  ;;  %v306_v1 = vld [vmem:[%s635_s1 + $0xc] sm:$0xf0]  ;;  %v305_v3 = vor.u32 %v400_v63, %v304_v62  ;;  %v312_v4 = vld [vmem:[%s635_s1 + $0x8] sm:$0xf]  ;;  %v401_v5 = vld [vmem:[%s635_s1 + $0x10] sm:$0xf0] }
  0x11   :  { %207 = vmatpush.bf16.msra.mxu1 %v357_v34  ;;  %v309_v6 = vor.u32 %v399_v0, %v306_v1  ;;  %v398_v7 = vld [vmem:[%s636_s0] sm:$0xff]  ;;  %v313_v8 = vor.u32 %v401_v5, %v312_v4 }
  0x12   :  { %v48_v9 = vld [vmem:[%s637_s2] sm:$0x7] }
  0x13   :  { %221 = vmatpush.bf16.msra.mxu2 %v361_v39  ;;  %v50_v10 = vperm.slane %v48_v9, 0  ;;  %v51_v11 = vperm.slane %v48_v9, 1  ;;  %v52_v20 = vperm.slane %v48_v9, 2 }
  0x14   :  { %194 = vmatpush.bf16.msra.mxu0 %v341_v40 }
  0x15   :  { %208 = vmatpush.bf16.msra.mxu1 %v345_v43 }
  0x17   :  { %222 = vmatpush.bf16.msra.mxu2 %v349_v48 }
  0x18   :  { %195 = vmatpush.bf16.msra.mxu0 %v329_v49 }
  0x19   :  { %209 = vmatpush.bf16.msra.mxu1 %v333_v52 }
  0x1b   :  { %223 = vmatpush.bf16.msra.mxu2 %v337_v57 }
  0x1c   :  { %196 = vmatpush.bf16.msra.mxu0 %v317_v58 }
  0x1d   :  { %210 = vmatpush.bf16.msra.mxu1 %v321_v61 }
  0x1f   :  { %224 = vmatpush.bf16.msra.mxu2 %v325_v2 }
  0x20   :  { %197 = vmatpush.bf16.msra.mxu0 %v305_v3 }
  0x21   :  { %211 = vmatpush.bf16.msra.mxu1 %v309_v6 }
  0x23   :  { %198 = vmatmul.bf16.vlgmr.msra.gmra.mxu0 %v398_v7  ;;  %225 = vmatpush.bf16.msra.mxu2 %v313_v8 }
  0x24   :  { %212 = vmatmul.bf16.vlgmr.msra.gmra.mxu1 %v398_v7 }
  0x26   :  { %226 = vmatmul.bf16.vlgmr.msra.gmra.mxu2 %v398_v7 }
  0xa0   :  { %v199_v12 = vpop.f32.mrf.mxu0 }
  0xa1   :  { %v200_v13 = vadd.f32 %v199_v12, %v50_v10  ;;  %v213_v14 = vpop.f32.mrf.mxu1 }
  0xa2   :  { %v214_v15 = vadd.f32 %v213_v14, %v51_v11 }
  0xa3   :  { %v232_v16 = vsub.f32 0.0, %v200_v13 }
  0xa4   :  { %v250_v17 = vand.u32 2147483647, %v214_v15  ;;  %v248_v59 = vmax.f32 %v214_v15, 0.0 }
  0xa5   :  { %v234_v18 = vmin.f32 %v232_v16, 80.0 }
  0xa6   :  { %v252_v19 = vsub.f32 0.0, %v250_v17 }
  0xa7   :  { %v236_v21 = vmul.f32 1.442695, %v234_v18 }
  0xa8   :  { %v254_v22 = vmul.f32 1.442695, %v252_v19  ;;  %v201_v23 = vpop.f32.mrf.mxu0 }
  0xa9   :  { %423 = vpow2.f32 %v236_v21  ;;  %v202_v24 = vadd.f32 %v201_v23, %v50_v10  ;;  %v215_v25 = vpop.f32.mrf.mxu1  ;;  %v227_v26 = vpop.f32.mrf.mxu2 }
  0xaa   :  { %425 = vpow2.f32 %v254_v22  ;;  %v613_v27 = vadd.f32 %v215_v25, %v51_v11  ;;  %v228_v28 = vadd.f32 %v227_v26, %v52_v20 }
  0xab   :  { %v233_v29 = vsub.f32 0.0, %v202_v24 }
  0xac   :  { %v251_v30 = vand.u32 2147483647, %v613_v27  ;;  %v284_v31 = vmax.f32 %v228_v28, -11.512925  ;;  %v249_v10 = vmax.f32 %v613_v27, 0.0 }
  0xad   :  { %v235_v32 = vmin.f32 %v233_v29, 80.0 }
  0xae   :  { %v253_v33 = vsub.f32 0.0, %v251_v30  ;;  %v286_v34 = vmin.f32 %v284_v31, 13.815511 }
  0xaf   :  { %v424_v35 = vpop.eup %423  ;;  %v238_v36 = vmul.f32 1.442695, %v235_v32 }
  0xb0   :  { %v426_v37 = vpop.eup %425  ;;  %v240_v38 = vadd.f32 1.0, %v424_v35  ;;  %v256_v39 = vmul.f32 1.442695, %v253_v33  ;;  %v288_v41 = vmul.f32 1.442695, %v286_v34 }
  0xb1   :  { %v258_v40 = vadd.f32 1.0, %v426_v37  ;;  %427 = vpow2.f32 %v238_v36  ;;  %v229_v42 = vpop.f32.mrf.mxu2  ;;  %v261_v43 = vmul.f32 -0.5, %v426_v37  ;;  %v264_v49 = vand.u32 2147483647, %v426_v37 }
  0xb2   :  { %429 = vrcp.f32 %v240_v38  ;;  %v230_v44 = vadd.f32 %v229_v42, %v52_v20 }
  0xb3   :  { %431 = vlog2.f32 %v258_v40  ;;  %v262_v46 = vadd.f32 1.0, %v261_v43  ;;  %vm265_vm0 = vcmp.lt.f32.partialorder %v264_v49, 0.0004427343 }
  0xb4   :  { %433 = vpow2.f32 %v256_v39  ;;  %v285_v45 = vmax.f32 %v230_v44, -11.512925 }
  0xb5   :  { %435 = vpow2.f32 %v288_v41  ;;  %v263_v57 = vmul.f32 %v426_v37, %v262_v46 }
  0xb6   :  { %v287_v47 = vmin.f32 %v285_v45, 13.815511 }
  0xb7   :  { %v428_v48 = vpop.eup %427 }
  0xb8   :  { %v430_v50 = vpop.eup %429  ;;  %v241_v51 = vadd.f32 1.0, %v428_v48  ;;  %v290_v52 = vmul.f32 1.442695, %v287_v47 }
  0xb9   :  { %v432_v53 = vpop.eup %431  ;;  %v244_v54 = vmin.f32 %v430_v50, 1.0 }
  0xba   :  { %v434_v55 = vpop.eup %433  ;;  %v260_v56 = vmul.f32 0.6931472, %v432_v53  ;;  %437 = vrcp.f32 %v241_v51 }
  0xbb   :  { %v436_v58 = vpop.eup %435  ;;  %246 = vst [vmem:[%s638_s3] sm:$0xff] %v244_v54  ;;  %v267_v60 = vadd.f32 1.0, %v434_v55  ;;  %439 = vpow2.f32 %v290_v52  ;;  %v270_v62 = vmul.f32 -0.5, %v434_v55  ;;  %v273_v6 = vand.u32 2147483647, %v434_v55 }
  0xbc   :  { %v266_v61 = vsel %vm265_vm0, %v263_v57, %v260_v56  ;;  %292 = vst [vmem:[%s638_s3 + $0x10] sm:$0xff] %v436_v58 }
  0xbd   :  { %v276_v63 = vadd.f32 %v266_v61, %v248_v59  ;;  %441 = vlog2.f32 %v267_v60  ;;  %v271_v2 = vadd.f32 1.0, %v270_v62  ;;  %vm274_vm1 = vcmp.lt.f32.partialorder %v273_v6, 0.0004427343 }
  0xbf   :  { %v278_v0 = vmax.f32 %v276_v63, 0.0001  ;;  %v272_v9 = vmul.f32 %v434_v55, %v271_v2 }
  0xc0   :  { %v438_v1 = vpop.eup %437 }
  0xc1   :  { %v440_v3 = vpop.eup %439  ;;  %v280_v4 = vmin.f32 %v278_v0, 10000.0  ;;  %v245_v5 = vmin.f32 %v438_v1, 1.0 }
  0xc2   :  { %293 = vst [vmem:[%s638_s3 + $0x28] sm:$0xff] %v440_v3 }
  0xc3   :  { %v442_v7 = vpop.eup %441  ;;  %282 = vst [vmem:[%s638_s3 + $0x8] sm:$0xff] %v280_v4 }
  0xc4   :  { %247 = vst [vmem:[%s638_s3 + $0x18] sm:$0xff] %v245_v5  ;;  %v269_v8 = vmul.f32 0.6931472, %v442_v7 }
  0xc6   :  { %v275_v11 = vsel %vm274_vm1, %v272_v9, %v269_v8 }
  0xc7   :  { %v277_v12 = vadd.f32 %v275_v11, %v249_v10 }
  0xc9   :  { %v279_v13 = vmax.f32 %v277_v12, 0.0001 }
  0xcb   :  { %v281_v14 = vmin.f32 %v279_v13, 10000.0 }
  0xcd   :  { %283 = vst [vmem:[%s638_s3 + $0x20] sm:$0xff] %v281_v14 }

</bundles_post_ra>
